<compile_context>
chip_gen: v5e
topology: v5e:2x2
jax: 0.10.0
libtpu: 0.0.40
codegen_flags: <defaults>
</compile_context>

<pallas_src>
import math

import jax
import jax.numpy as jnp
from jax.experimental import pallas as pl
from jax.experimental.pallas import tpu as pltpu


def build_pe(embed_dim: int, max_len: int = 5000) -> jnp.ndarray:
    """Build the (max_len, 1, embed_dim) sinusoidal positional table (pure glue,
    identical math to the PyTorch module's __init__)."""
    position = jnp.arange(0, max_len, dtype=jnp.float32)[:, None]            # (L, 1)
    div_term = jnp.exp(
        jnp.arange(0, embed_dim, 2, dtype=jnp.float32)
        * (-math.log(10000.0) / embed_dim)
    )                                                                         # (ceil(E/2),)
    pe = jnp.zeros((max_len, embed_dim), dtype=jnp.float32)
    pe = pe.at[:, 0::2].set(jnp.sin(position * div_term))
    if embed_dim % 2 == 1:
        pe = pe.at[:, 1::2].set(jnp.cos(position * div_term[:-1]))
    else:
        pe = pe.at[:, 1::2].set(jnp.cos(position * div_term))
    return pe[:, None, :]                                                     # (L, 1, E)


def _add_pe_kernel(x_ref, pe_ref, o_ref):
    # x_ref: (TS, B, E) block, pe_ref: (TS, 1, E) block -> broadcast add over
    # batch on the VPU.  astype keeps the store dtype correct if x is not f32.
    o_ref[...] = (x_ref[...] + pe_ref[...]).astype(o_ref.dtype)


# Target double-buffered VMEM working set (x tile + out tile + pe tile, x2
# pipeline buffers).  24 MiB fits comfortably under v7x's 32 MiB default scoped
# limit / 64 MiB physical VMEM, and well under v5e/v6e's 128 MiB physical.
_VMEM_WORKSET_BUDGET = 24 * 1024 * 1024


def _pick_seq_tile(S: int, B: int, E: int, itemsize: int) -> int:
    """Largest seq-tile whose double-buffered (VMEM-padded) tile set fits the budget."""
    b_pad = -(-B // 8) * 8          # batch occupies sublanes -> padded to 8
    e_pad = -(-E // 128) * 128      # embed occupies lanes    -> padded to 128
    # per sequence row in VMEM: x row + out row (b_pad sublanes each) + pe row
    # (singleton batch padded to 8 sublanes).
    per_row = (2 * b_pad + 8) * e_pad * itemsize
    ts = _VMEM_WORKSET_BUDGET // (2 * per_row)    # x2 for double-buffering
    ts = max(int(ts), 8)
    if ts >= 128:
        ts = (ts // 128) * 128                    # keep grid steps nicely aligned
    else:
        ts = max((ts // 8) * 8, 8)
    return min(S, ts)


def positional_encoding(x: jnp.ndarray, pe: jnp.ndarray, *, block_rows=None) -> jnp.ndarray:
    """x: (S, B, E); pe: (max_len, 1, E). Returns x + pe[:S] (broadcast over batch)."""
    S, B, E = x.shape
    max_len = pe.shape[0]
    assert S <= max_len, "sequence longer than positional table"

    ts = block_rows if block_rows is not None else _pick_seq_tile(S, B, E, x.dtype.itemsize)
    ts = min(int(ts), S)
    grid = (pl.cdiv(S, ts),)

    return pl.pallas_call(
        _add_pe_kernel,
        out_shape=jax.ShapeDtypeStruct((S, B, E), x.dtype),
        grid=grid,
        in_specs=[
            pl.BlockSpec((ts, B, E), lambda i: (i, 0, 0)),   # x tile
            pl.BlockSpec((ts, 1, E), lambda i: (i, 0, 0)),   # pe rows picked by index_map
        ],
        out_specs=pl.BlockSpec((ts, B, E), lambda i: (i, 0, 0)),
        compiler_params=pltpu.CompilerParams(
            # No reduction axis: every output block written once -> parallel
            # (enables megacore sharding of S-tiles on v7x; free on v5e/v6e).
            dimension_semantics=("parallel",),
            vmem_limit_bytes=32 * 1024 * 1024,
        ),
    )(x, pe)


if __name__ == "__main__":
    # Small-but-aligned demo shapes: E a multiple of 128 and B=8 keep the last
    # two block dims lane/sublane-dense; block_rows=64 forces a 4-step
    # pipelined grid even at this small size (auto-derivation would pick a
    # single 256-row tile here).
    seq_len, batch, embed_dim = 256, 8, 128
    max_len = 512  # same shape semantics as the module's default 5000

    key = jax.random.PRNGKey(0)
    x = jax.random.normal(key, (seq_len, batch, embed_dim), dtype=jnp.float32)

    pe = build_pe(embed_dim, max_len)

    out = positional_encoding(x, pe, block_rows=64)
    out = jax.block_until_ready(out)

    # Reference check in plain JAX (same math as the PyTorch forward).
    ref = x + pe[:seq_len]
    assert out.shape == (seq_len, batch, embed_dim)
    assert jnp.allclose(out, ref, atol=1e-6), "mismatch vs reference"

    print("KERNEL_OK")
</pallas_src>

<mosaic_0001>
module attributes {stable_mosaic.version = 11 : i64} {
  func.func @_add_pe_kernel(%arg0: i32, %arg1: memref<64x8x128xf32, #tpu.memory_space<vmem>>, %arg2: memref<64x1x128xf32, #tpu.memory_space<vmem>>, %arg3: memref<64x8x128xf32, #tpu.memory_space<vmem>>) attributes {dimension_semantics = [#tpu.dimension_semantics<parallel>], iteration_bounds = array<i64: 4>, scalar_prefetch = 0 : i64, scratch_operands = 0 : i64, tpu.core_type = #tpu.core_type<tc>, window_params = [{transform_indices = @transform_0, window_bounds = array<i64: 64, 8, 128>}, {transform_indices = @transform_1, window_bounds = array<i64: 64, 1, 128>}, {transform_indices = @transform_2, window_bounds = array<i64: 64, 8, 128>}]} {
    %c0 = arith.constant 0 : index
    %c0_0 = arith.constant 0 : index
    %c0_1 = arith.constant 0 : index
    %0 = vector.load %arg1[%c0, %c0_0, %c0_1] : memref<64x8x128xf32, #tpu.memory_space<vmem>>, vector<64x8x128xf32>
    %c0_2 = arith.constant 0 : index
    %c0_3 = arith.constant 0 : index
    %c0_4 = arith.constant 0 : index
    %1 = vector.load %arg2[%c0_2, %c0_3, %c0_4] : memref<64x1x128xf32, #tpu.memory_space<vmem>>, vector<64x1x128xf32>
    %2 = vector.broadcast %1 : vector<64x1x128xf32> to vector<64x8x128xf32>
    %3 = arith.addf %0, %2 : vector<64x8x128xf32>
    %c0_5 = arith.constant 0 : index
    %c0_6 = arith.constant 0 : index
    %c0_7 = arith.constant 0 : index
    %4 = vector.load %arg3[%c0_5, %c0_6, %c0_7] : memref<64x8x128xf32, #tpu.memory_space<vmem>>, vector<64x8x128xf32>
    tpu.vector_store %arg3[%c0_5, %c0_6, %c0_7], %3 {strides = array<i32>} : memref<64x8x128xf32, #tpu.memory_space<vmem>>, vector<64x8x128xf32>,
    return
  }
  func.func @transform_0(%arg0: i32) -> (i32, i32, i32) {
    %c0_i32 = arith.constant 0 : i32
    %c0_i32_0 = arith.constant 0 : i32
    %c0_i32_1 = arith.constant 0 : i32
    return %arg0, %c0_i32, %c0_i32_0 : i32, i32, i32
  }
  func.func @transform_1(%arg0: i32) -> (i32, i32, i32) {
    %c0_i32 = arith.constant 0 : i32
    %c0_i32_0 = arith.constant 0 : i32
    %c0_i32_1 = arith.constant 0 : i32
    return %arg0, %c0_i32, %c0_i32_0 : i32, i32, i32
  }
  func.func @transform_2(%arg0: i32) -> (i32, i32, i32) {
    %c0_i32 = arith.constant 0 : i32
    %c0_i32_0 = arith.constant 0 : i32
    %c0_i32_1 = arith.constant 0 : i32
    return %arg0, %c0_i32, %c0_i32_0 : i32, i32, i32
  }
}

</mosaic_0001>

<bundles_post_ra>
// kernel: tpu_custom_call.1
= control target key start
LH: loop header
LB: loop body
LE: loop exit
PB: predicated region body
PF: predicated region fallthrough
CT: control target
= control target key end

     0   :  { %7 = vsyncpa [#allocation3], 0  ;;  %s1428_s0 = inlined_call_operand.hbm [shape: f32[256,8,128], index: 0, kind: input, shape index: {}]   ;;  %s1429_s1 = inlined_call_operand.hbm [shape: f32[512,1,128], index: 1, kind: input, shape index: {}]   ;;  %s1430_s2 = inlined_call_operand.hbm [shape: f32[256,8,128], index: 2, kind: output, shape index: {}]  }
   0x1   :  { %9 = vsyncpa [#allocation3 + $0x1], 0 }
   0x2   :  { %10 = vsyncpa [#allocation6], 0 }
   0x3   :  { %12 = vsyncpa [#allocation6 + $0x1], 0 }
   0x4   :  { %13 = vsyncpa [#allocation4], 0 }
   0x5   :  { %15 = vsyncpa [#allocation4 + $0x1], 0  ;;  %s1061_s9 = smov 0   ;;  %s1063_s10 = smov 0  }
   0x6   :  { %s1065_s11 = smov 0   ;;  %s1067_s12 = smov 0  }
   0x7 LB: > { %s1082_s13 = sadd.s32 4294967295, %s1038_s12   ;;  %s768_s14 = sadd.s32 4294967294, %s1038_s12   ;;  %s1038_s12 = sphi %s1067_s12, %s1440_s12   ;;  %s1034_s11 = sphi %s1065_s11, %s1439_s11   ;;  %s1030_s10 = sphi %s1063_s10, %s1438_s10   ;;  %s1026_s9 = sphi %s1061_s9, %s1437_s9  }
   0x8   : > { %s1086_s15 = sadd.s32 1, %s1038_s12   ;;  %s28_s16 = sadd.s32 1, %s1034_s11 }
   0x9   : > { %s25_s17 = ssub.s32 %s1038_s12, %s1086_s15  ;;  %p35_p0 = scmp.ne.s32.totalorder %s1034_s11, %s1030_s10 }
   0xa   : > { %p26_p1 = scmp.eq.s32.totalorder %s25_s17, 0  ;;  %p36_p2 = scmp.eq.s32.totalorder %s1038_s12, 0 }
   0xb   : > { %p41_p3 = scmp.ne.s32.totalorder %s1030_s10, %s1026_s9  ;;  %p42_p4 = scmp.eq.s32.totalorder %s1082_s13, 0 }
   0xc   : > { %s1098_s18 = scalar_select %p26_p1, %s1034_s11, %s28_s16  }
   0xd   : > { %p1100_p5 = por %p36_p2, %p35_p0  ;;  %p1104_p6 = por %p42_p4, %p41_p3 }
   0xe   : > { %p91_p7 = scmp.eq.s32.totalorder %s1082_s13, 3  ;;  %p97_p8 = scmp.eq.s32.totalorder %s768_s14, 3 }
   0xf   : > { %p804_p9 = scmp.lt.s32.totalorder %s1038_s12, 4  ;;  %s1119_s23 = sand.u32 1, %s1034_s11  }
  0x10   : > { %p1110_p10 = por %p91_p7, %p35_p0  ;;  %p1114_p11 = por %p97_p8, %p41_p3 }
  0x11   : > { %s785_s24 = sshll.u32 %s1038_s12, 9  ;;  %s771_s25 = sshll.u32 %s1119_s23, 9 }
  0x12   : > { %s126_s28 = scalar_lea.hbm %s1428_s0, %s785_s24  ;;  %s121_s30 = scalar_lea.vmem [#allocation2], %s771_s25 }
  0x13   : > { %s127_s29 = sshll.u32 %s126_s28, 4  ;;  %s129_s3 = sshll.u32 %s121_s30, 4  ;;  %s128_s29 = int_to_ptr.hbm [resolvable:$true] %s127_s29  ;;  %s130_s3 = int_to_ptr.vmem [resolvable:$true] %s129_s3 }
  0x14   : > { %p1128_p12 = pnand %p804_p9, %p1100_p5  ;;  %p776_p13 = scmp.ge.s32.totalorder %s1038_s12, 1 }
  0x15   : > { %p158_p0 = scmp.lt.s32.totalorder %s1038_s12, 5  ;;  %s118_s5 = scalar_lea.sflag [#allocation3], %s1119_s23 }
  0x16   : > { %s908_s6 = sshra.s32 %s128_s29, 4  ;;  %p912_p2 = pneg %p1128_p12  ;;  %s909_s6 = int_to_ptr.hbm [resolvable:$true] %s908_s6 }
  0x17   : > { %s910_s7 = scalar_lea.hbm %s909_s6, 512  ;;  %s915_s16 = scalar_lea.hbm %s1428_s0, 2048 }
  0x18   : > { %p911_p1 = scmp.ne.s32.totalorder %s909_s6, %s910_s7  ;;  %p916_p5 = scmp.lt.s32.totalorder %s909_s6, %s1428_s0 }
  0x19   : > { %p917_p7 = scmp.lt.s32.totalorder %s915_s16, %s910_s7 }
  0x1a   : > { %p913_p3 = pnand %p912_p2, %p911_p1 }
  0x1b   : > { %p918_p8 = por %p917_p7, %p916_p5 }
  0x1c   : > { %p914_p4 = pneg %p913_p3 }
  0x1e   : > { %p919_p9 = pnand %p918_p8, %p914_p4 }
  0x20   : > { %922 = shalt.err (!%p919_p9)
}
  0x21   : > { %s1040_s24 = smov 128   ;;  %s1041_s25 = smov 8  }
  0x22   : > { %796 = dma.hbm_to_vmem [thread:$0]  (!%p1128_p12), %s128_s29, 8192, %s130_s3, %s118_s5, %s1040_s24, %s1040_s24, %s1041_s25  }
  0x23   : > { %p1152_p1 = pnand %p776_p13, %p158_p0  ;;  %s774_s27 = sshll.u32 %s1119_s23, 6 }
  0x24   : > { %s775_s28 = sshll.u32 %s1038_s12, 6  ;;  %s143_s14 = scalar_lea.vmem [#allocation5], %s774_s27 }
  0x25   : > { %s147_s7 = scalar_lea.hbm %s1429_s1, %s775_s28  ;;  %s150_s16 = sshll.u32 %s143_s14, 4  ;;  %s151_s16 = int_to_ptr.vmem [resolvable:$true] %s150_s16 }
  0x26   : > { %s148_s8 = sshll.u32 %s147_s7, 4  ;;  %s140_s17 = scalar_lea.sflag [#allocation6], %s1119_s23  ;;  %s149_s8 = int_to_ptr.hbm [resolvable:$true] %s148_s8 }
  0x27   : > { %s938_s19 = sshra.s32 %s149_s8, 4  ;;  %s945_s24 = scalar_lea.hbm %s1429_s1, 512  ;;  %s939_s19 = int_to_ptr.hbm [resolvable:$true] %s938_s19 }
  0x28   : > { %s940_s29 = scalar_lea.hbm %s939_s19, 64  ;;  %p946_p4 = scmp.lt.s32.totalorder %s939_s19, %s1429_s1 }
  0x29   : > { %p941_p3 = scmp.ne.s32.totalorder %s939_s19, %s940_s29  ;;  %p947_p5 = scmp.lt.s32.totalorder %s945_s24, %s940_s29 }
  0x2b   : > { %p943_p13 = pnand %p941_p3, %p912_p2  ;;  %p948_p7 = por %p947_p5, %p946_p4 }
  0x2d   : > { %p944_p0 = pneg %p943_p13 }
  0x2f   : > { %p949_p8 = pnand %p948_p7, %p944_p0 }
  0x31   : > { %952 = shalt.err (!%p949_p8)
}
  0x32   : > { %s1042_s23 = smov 16   ;;  %s1043_s27 = smov 1  }
  0x33   : > { %799 = dma.hbm_to_vmem [thread:$0]  (!%p1128_p12), %s149_s8, 1024, %s151_s16, %s140_s17, %s1042_s23, %s1042_s23, %s1043_s27  }
  0x34   : > { %162 = sbr.rel (%p1152_p1) target bundleno = 132 (0x84), region = 28  ;;  %s1176_s30 = sand.u32 (!%p1152_p1), 1, %s1030_s10  }
  0x35   : > { %s777_s6 = sshll.u32 (!%p1152_p1), %s1176_s30, 9  ;;  %s165_s7 = scalar_lea.sflag (!%p1152_p1), [#allocation3], %s1176_s30 }
  0x36   : > { %s1180_s14 = scalar_lea.vmem (!%p1152_p1), [#allocation2], %s777_s6 }
  0x39   : > { %1013 = dma.done.wait (%p1104_p6), %s165_s7, 8192  }
  0x3a   : > { %1015 = vsyncadd (%p1104_p6), %s165_s7, 4294959104  ;;  %s778_s4 = sshll.u32 %s1176_s30, 6  ;;  %s175_s26 = scalar_lea.sflag [#allocation6], %s1176_s30 }
  0x3b   : > { %s1188_s8 = scalar_lea.vmem [#allocation5], %s778_s4 }
  0x3c   : > { %1017 = dma.done.wait (%p1104_p6), %s175_s26, 1024  }
  0x3d   : > { %1019 = vsyncadd (%p1104_p6), %s175_s26, 4294966272  ;;  %s786_s16 = sshll.u32 %s1082_s13, 9  ;;  %v208_v0 = vld [vmem:[%s1180_s14] sm:$0xff]  ;;  %v209_v2 = vld [vmem:[%s1180_s14 + $0x8] sm:$0xff]  ;;  %s1208_s13 = scalar_lea.vmem [#allocation7], %s777_s6 }
  0x3e   : > { %v844_v1 = vld [vmem:[%s1188_s8] ss:$0 sm:$0xff]  ;;  %v845_v3 = vld [vmem:[%s1188_s8 + $0x1] ss:$0 sm:$0xff]  ;;  %s1202_s20 = scalar_lea.hbm %s1430_s2, %s786_s16  ;;  %v210_v5 = vld [vmem:[%s1180_s14 + $0x10] sm:$0xff]  ;;  %s669_s29 = sshll.u32 %s1208_s13, 4  ;;  %s670_s29 = int_to_ptr.vmem [resolvable:$true] %s669_s29 }
  0x3f   : > { %v528_v4 = vadd.f32 %v844_v1, %v208_v0  ;;  %v846_v6 = vld [vmem:[%s1188_s8 + $0x2] ss:$0 sm:$0xff]  ;;  %v529_v7 = vadd.f32 %v845_v3, %v209_v2  ;;  %v211_v8 = vld [vmem:[%s1180_s14 + $0x18] sm:$0xff]  ;;  %v847_v9 = vld [vmem:[%s1188_s8 + $0x3] ss:$0 sm:$0xff]  ;;  %s671_s3 = sshll.u32 %s1202_s20, 4  ;;  %s672_s3 = int_to_ptr.hbm [resolvable:$true] %s671_s3 }
  0x40   : > { %v530_v10 = vadd.f32 %v846_v6, %v210_v5  ;;  %v212_v11 = vld [vmem:[%s1180_s14 + $0x20] sm:$0xff]  ;;  %v531_v13 = vadd.f32 %v847_v9, %v211_v8  ;;  %v213_v14 = vld [vmem:[%s1180_s14 + $0x28] sm:$0xff]  ;;  %v214_v17 = vld [vmem:[%s1180_s14 + $0x30] sm:$0xff]  ;;  %s657_s5 = scalar_lea.sflag [#allocation4], %s1176_s30  ;;  %s982_s24 = sshra.s32 %s672_s3, 4  ;;  %s983_s24 = int_to_ptr.hbm [resolvable:$true] %s982_s24 }
  0x41   : > { %592 = vst [vmem:[%s1208_s13] sm:$0xff] %v528_v4  ;;  %v848_v12 = vld [vmem:[%s1188_s8 + $0x4] ss:$0 sm:$0xff]  ;;  %v849_v15 = vld [vmem:[%s1188_s8 + $0x5] ss:$0 sm:$0xff]  ;;  %v850_v18 = vld [vmem:[%s1188_s8 + $0x6] ss:$0 sm:$0xff]  ;;  %p989_p9 = scmp.lt.s32.totalorder %s983_s24, %s1430_s2 }
  0x42   : > { %593 = vst [vmem:[%s1208_s13 + $0x8] sm:$0xff] %v529_v7  ;;  %v532_v16 = vadd.f32 %v848_v12, %v212_v11  ;;  %v533_v19 = vadd.f32 %v849_v15, %v213_v14  ;;  %v215_v20 = vld [vmem:[%s1180_s14 + $0x38] sm:$0xff]  ;;  %v851_v21 = vld [vmem:[%s1188_s8 + $0x7] ss:$0 sm:$0xff]  ;;  %v534_v22 = vadd.f32 %v850_v18, %v214_v17  ;;  %v852_v24 = vld [vmem:[%s1188_s8 + $0x8] ss:$0 sm:$0xff] }
  0x43   : > { %594 = vst [vmem:[%s1208_s13 + $0x10] sm:$0xff] %v530_v10  ;;  %v216_v23 = vld [vmem:[%s1180_s14 + $0x40] sm:$0xff]  ;;  %v535_v25 = vadd.f32 %v851_v21, %v215_v20  ;;  %v217_v26 = vld [vmem:[%s1180_s14 + $0x48] sm:$0xff]  ;;  %v218_v29 = vld [vmem:[%s1180_s14 + $0x50] sm:$0xff]  ;;  %s984_s25 = scalar_lea.hbm %s983_s24, 512  ;;  %s988_s27 = scalar_lea.hbm %s1430_s2, 2048 }
  0x44   : > { %595 = vst [vmem:[%s1208_s13 + $0x18] sm:$0xff] %v531_v13  ;;  %v853_v27 = vld [vmem:[%s1188_s8 + $0x9] ss:$0 sm:$0xff]  ;;  %v536_v28 = vadd.f32 %v852_v24, %v216_v23  ;;  %v854_v30 = vld [vmem:[%s1188_s8 + $0xa] ss:$0 sm:$0xff]  ;;  %v219_v32 = vld [vmem:[%s1180_s14 + $0x58] sm:$0xff]  ;;  %p985_p6 = scmp.ne.s32.totalorder %s983_s24, %s984_s25  ;;  %p990_p1 = scmp.lt.s32.totalorder %s988_s27, %s984_s25 }
  0x45   : > { %596 = vst [vmem:[%s1208_s13 + $0x20] sm:$0xff] %v532_v16  ;;  %v537_v31 = vadd.f32 %v853_v27, %v217_v26  ;;  %v855_v33 = vld [vmem:[%s1188_s8 + $0xb] ss:$0 sm:$0xff]  ;;  %v538_v34 = vadd.f32 %v854_v30, %v218_v29  ;;  %v220_v35 = vld [vmem:[%s1180_s14 + $0x60] sm:$0xff]  ;;  %v856_v36 = vld [vmem:[%s1188_s8 + $0xc] ss:$0 sm:$0xff] }
  0x46   : > { %597 = vst [vmem:[%s1208_s13 + $0x28] sm:$0xff] %v533_v19  ;;  %v539_v37 = vadd.f32 %v855_v33, %v219_v32  ;;  %v221_v38 = vld [vmem:[%s1180_s14 + $0x68] sm:$0xff]  ;;  %v540_v40 = vadd.f32 %v856_v36, %v220_v35  ;;  %v222_v41 = vld [vmem:[%s1180_s14 + $0x70] sm:$0xff]  ;;  %v223_v44 = vld [vmem:[%s1180_s14 + $0x78] sm:$0xff]  ;;  %p986_p12 = pnand %p985_p6, %p1110_p10  ;;  %p991_p3 = por %p990_p1, %p989_p9 }
  0x47   : > { %598 = vst [vmem:[%s1208_s13 + $0x30] sm:$0xff] %v534_v22  ;;  %v857_v39 = vld [vmem:[%s1188_s8 + $0xd] ss:$0 sm:$0xff]  ;;  %v858_v42 = vld [vmem:[%s1188_s8 + $0xe] ss:$0 sm:$0xff]  ;;  %v224_v47 = vld [vmem:[%s1180_s14 + $0x80] sm:$0xff] }
  0x48   : > { %599 = vst [vmem:[%s1208_s13 + $0x38] sm:$0xff] %v535_v25  ;;  %v541_v43 = vadd.f32 %v857_v39, %v221_v38  ;;  %v859_v45 = vld [vmem:[%s1188_s8 + $0xf] ss:$0 sm:$0xff]  ;;  %v542_v46 = vadd.f32 %v858_v42, %v222_v41  ;;  %v860_v48 = vld [vmem:[%s1188_s8 + $0x10] ss:$0 sm:$0xff]  ;;  %v227_v56 = vld [vmem:[%s1180_s14 + $0x98] sm:$0xff]  ;;  %p987_p2 = pneg %p986_p12 }
  0x49   : > { %600 = vst [vmem:[%s1208_s13 + $0x40] sm:$0xff] %v536_v28  ;;  %v543_v49 = vadd.f32 %v859_v45, %v223_v44  ;;  %v225_v50 = vld [vmem:[%s1180_s14 + $0x88] sm:$0xff]  ;;  %v861_v51 = vld [vmem:[%s1188_s8 + $0x11] ss:$0 sm:$0xff]  ;;  %v544_v52 = vadd.f32 %v860_v48, %v224_v47  ;;  %v862_v54 = vld [vmem:[%s1188_s8 + $0x12] ss:$0 sm:$0xff] }
  0x4a   : > { %601 = vst [vmem:[%s1208_s13 + $0x48] sm:$0xff] %v537_v31  ;;  %v226_v53 = vld [vmem:[%s1180_s14 + $0x90] sm:$0xff]  ;;  %v545_v55 = vadd.f32 %v861_v51, %v225_v50  ;;  %v228_v59 = vld [vmem:[%s1180_s14 + $0xa0] sm:$0xff]  ;;  %v229_v62 = vld [vmem:[%s1180_s14 + $0xa8] sm:$0xff]  ;;  %p992_p13 = pnand %p991_p3, %p987_p2 }
  0x4b   : > { %602 = vst [vmem:[%s1208_s13 + $0x50] sm:$0xff] %v538_v34  ;;  %v863_v57 = vld [vmem:[%s1188_s8 + $0x13] ss:$0 sm:$0xff]  ;;  %v546_v58 = vadd.f32 %v862_v54, %v226_v53  ;;  %v864_v60 = vld [vmem:[%s1188_s8 + $0x14] ss:$0 sm:$0xff]  ;;  %v231_v4 = vld [vmem:[%s1180_s14 + $0xb8] sm:$0xff] }
  0x4c   : > { %603 = vst [vmem:[%s1208_s13 + $0x58] sm:$0xff] %v539_v37  ;;  %v547_v61 = vadd.f32 %v863_v57, %v227_v56  ;;  %v865_v63 = vld [vmem:[%s1188_s8 + $0x15] ss:$0 sm:$0xff]  ;;  %v548_v0 = vadd.f32 %v864_v60, %v228_v59  ;;  %v866_v2 = vld [vmem:[%s1188_s8 + $0x16] ss:$0 sm:$0xff]  ;;  %v232_v7 = vld [vmem:[%s1180_s14 + $0xc0] sm:$0xff] }
  0x4d   : > { %604 = vst [vmem:[%s1208_s13 + $0x60] sm:$0xff] %v540_v40  ;;  %v230_v1 = vld [vmem:[%s1180_s14 + $0xb0] sm:$0xff]  ;;  %v549_v3 = vadd.f32 %v865_v63, %v229_v62  ;;  %v868_v8 = vld [vmem:[%s1188_s8 + $0x18] ss:$0 sm:$0xff]  ;;  %v233_v10 = vld [vmem:[%s1180_s14 + $0xc8] sm:$0xff] }
  0x4e   : > { %605 = vst [vmem:[%s1208_s13 + $0x68] sm:$0xff] %v541_v43  ;;  %v867_v5 = vld [vmem:[%s1188_s8 + $0x17] ss:$0 sm:$0xff]  ;;  %v550_v6 = vadd.f32 %v866_v2, %v230_v1  ;;  %v869_v11 = vld [vmem:[%s1188_s8 + $0x19] ss:$0 sm:$0xff]  ;;  %v552_v12 = vadd.f32 %v868_v8, %v232_v7  ;;  %v236_v19 = vld [vmem:[%s1180_s14 + $0xe0] sm:$0xff] }
  0x4f   : > { %606 = vst [vmem:[%s1208_s13 + $0x70] sm:$0xff] %v542_v46  ;;  %v551_v9 = vadd.f32 %v867_v5, %v231_v4  ;;  %v234_v13 = vld [vmem:[%s1180_s14 + $0xd0] sm:$0xff]  ;;  %v870_v14 = vld [vmem:[%s1188_s8 + $0x1a] ss:$0 sm:$0xff]  ;;  %v553_v15 = vadd.f32 %v869_v11, %v233_v10  ;;  %v871_v17 = vld [vmem:[%s1188_s8 + $0x1b] ss:$0 sm:$0xff] }
  0x50   : > { %607 = vst [vmem:[%s1208_s13 + $0x78] sm:$0xff] %v543_v49  ;;  %v235_v16 = vld [vmem:[%s1180_s14 + $0xd8] sm:$0xff]  ;;  %v554_v18 = vadd.f32 %v870_v14, %v234_v13  ;;  %v237_v22 = vld [vmem:[%s1180_s14 + $0xe8] sm:$0xff]  ;;  %v238_v25 = vld [vmem:[%s1180_s14 + $0xf0] sm:$0xff] }
  0x51   : > { %608 = vst [vmem:[%s1208_s13 + $0x80] sm:$0xff] %v544_v52  ;;  %v872_v20 = vld [vmem:[%s1188_s8 + $0x1c] ss:$0 sm:$0xff]  ;;  %v555_v21 = vadd.f32 %v871_v17, %v235_v16  ;;  %v873_v23 = vld [vmem:[%s1188_s8 + $0x1d] ss:$0 sm:$0xff]  ;;  %v240_v31 = vld [vmem:[%s1180_s14 + $0x100] sm:$0xff] }
  0x52   : > { %609 = vst [vmem:[%s1208_s13 + $0x88] sm:$0xff] %v545_v55  ;;  %v556_v24 = vadd.f32 %v872_v20, %v236_v19  ;;  %v874_v26 = vld [vmem:[%s1188_s8 + $0x1e] ss:$0 sm:$0xff]  ;;  %v557_v27 = vadd.f32 %v873_v23, %v237_v22  ;;  %v875_v29 = vld [vmem:[%s1188_s8 + $0x1f] ss:$0 sm:$0xff]  ;;  %v241_v34 = vld [vmem:[%s1180_s14 + $0x108] sm:$0xff] }
  0x53   : > { %610 = vst [vmem:[%s1208_s13 + $0x90] sm:$0xff] %v546_v58  ;;  %v239_v28 = vld [vmem:[%s1180_s14 + $0xf8] sm:$0xff]  ;;  %v558_v30 = vadd.f32 %v874_v26, %v238_v25  ;;  %v876_v32 = vld [vmem:[%s1188_s8 + $0x20] ss:$0 sm:$0xff]  ;;  %v877_v35 = vld [vmem:[%s1188_s8 + $0x21] ss:$0 sm:$0xff] }
  0x54   : > { %611 = vst [vmem:[%s1208_s13 + $0x98] sm:$0xff] %v547_v61  ;;  %v559_v33 = vadd.f32 %v875_v29, %v239_v28  ;;  %v560_v36 = vadd.f32 %v876_v32, %v240_v31  ;;  %v242_v37 = vld [vmem:[%s1180_s14 + $0x110] sm:$0xff]  ;;  %v878_v38 = vld [vmem:[%s1188_s8 + $0x22] ss:$0 sm:$0xff]  ;;  %v561_v39 = vadd.f32 %v877_v35, %v241_v34  ;;  %v243_v40 = vld [vmem:[%s1180_s14 + $0x118] sm:$0xff] }
  0x55   : > { %612 = vst [vmem:[%s1208_s13 + $0xa0] sm:$0xff] %v548_v0  ;;  %v879_v41 = vld [vmem:[%s1188_s8 + $0x23] ss:$0 sm:$0xff]  ;;  %v562_v42 = vadd.f32 %v878_v38, %v242_v37  ;;  %v880_v44 = vld [vmem:[%s1188_s8 + $0x24] ss:$0 sm:$0xff]  ;;  %v245_v46 = vld [vmem:[%s1180_s14 + $0x128] sm:$0xff] }
  0x56   : > { %613 = vst [vmem:[%s1208_s13 + $0xa8] sm:$0xff] %v549_v3  ;;  %v244_v43 = vld [vmem:[%s1180_s14 + $0x120] sm:$0xff]  ;;  %v563_v45 = vadd.f32 %v879_v41, %v243_v40  ;;  %v246_v49 = vld [vmem:[%s1180_s14 + $0x130] sm:$0xff]  ;;  %v247_v52 = vld [vmem:[%s1180_s14 + $0x138] sm:$0xff] }
  0x57   : > { %614 = vst [vmem:[%s1208_s13 + $0xb0] sm:$0xff] %v550_v6  ;;  %v881_v47 = vld [vmem:[%s1188_s8 + $0x25] ss:$0 sm:$0xff]  ;;  %v564_v48 = vadd.f32 %v880_v44, %v244_v43  ;;  %v882_v50 = vld [vmem:[%s1188_s8 + $0x26] ss:$0 sm:$0xff]  ;;  %v249_v58 = vld [vmem:[%s1180_s14 + $0x148] sm:$0xff] }
  0x58   : > { %615 = vst [vmem:[%s1208_s13 + $0xb8] sm:$0xff] %v551_v9  ;;  %v565_v51 = vadd.f32 %v881_v47, %v245_v46  ;;  %v883_v53 = vld [vmem:[%s1188_s8 + $0x27] ss:$0 sm:$0xff]  ;;  %v566_v54 = vadd.f32 %v882_v50, %v246_v49  ;;  %v884_v56 = vld [vmem:[%s1188_s8 + $0x28] ss:$0 sm:$0xff]  ;;  %v250_v61 = vld [vmem:[%s1180_s14 + $0x150] sm:$0xff] }
  0x59   : > { %616 = vst [vmem:[%s1208_s13 + $0xc0] sm:$0xff] %v552_v12  ;;  %v248_v55 = vld [vmem:[%s1180_s14 + $0x140] sm:$0xff]  ;;  %v567_v57 = vadd.f32 %v883_v53, %v247_v52  ;;  %v885_v59 = vld [vmem:[%s1188_s8 + $0x29] ss:$0 sm:$0xff]  ;;  %v886_v62 = vld [vmem:[%s1188_s8 + $0x2a] ss:$0 sm:$0xff] }
  0x5a   : > { %617 = vst [vmem:[%s1208_s13 + $0xc8] sm:$0xff] %v553_v15  ;;  %v568_v60 = vadd.f32 %v884_v56, %v248_v55  ;;  %v569_v63 = vadd.f32 %v885_v59, %v249_v58  ;;  %v251_v0 = vld [vmem:[%s1180_s14 + $0x158] sm:$0xff]  ;;  %v887_v1 = vld [vmem:[%s1188_s8 + $0x2b] ss:$0 sm:$0xff]  ;;  %v570_v2 = vadd.f32 %v886_v62, %v250_v61  ;;  %v252_v3 = vld [vmem:[%s1180_s14 + $0x160] sm:$0xff] }
  0x5b   : > { %618 = vst [vmem:[%s1208_s13 + $0xd0] sm:$0xff] %v554_v18  ;;  %v888_v4 = vld [vmem:[%s1188_s8 + $0x2c] ss:$0 sm:$0xff]  ;;  %v571_v5 = vadd.f32 %v887_v1, %v251_v0  ;;  %v889_v7 = vld [vmem:[%s1188_s8 + $0x2d] ss:$0 sm:$0xff]  ;;  %v254_v9 = vld [vmem:[%s1180_s14 + $0x170] sm:$0xff] }
  0x5c   : > { %619 = vst [vmem:[%s1208_s13 + $0xd8] sm:$0xff] %v555_v21  ;;  %v253_v6 = vld [vmem:[%s1180_s14 + $0x168] sm:$0xff]  ;;  %v572_v8 = vadd.f32 %v888_v4, %v252_v3  ;;  %v255_v12 = vld [vmem:[%s1180_s14 + $0x178] sm:$0xff]  ;;  %v256_v15 = vld [vmem:[%s1180_s14 + $0x180] sm:$0xff] }
  0x5d   : > { %620 = vst [vmem:[%s1208_s13 + $0xe0] sm:$0xff] %v556_v24  ;;  %v890_v10 = vld [vmem:[%s1188_s8 + $0x2e] ss:$0 sm:$0xff]  ;;  %v573_v11 = vadd.f32 %v889_v7, %v253_v6  ;;  %v891_v13 = vld [vmem:[%s1188_s8 + $0x2f] ss:$0 sm:$0xff]  ;;  %v258_v21 = vld [vmem:[%s1180_s14 + $0x190] sm:$0xff] }
  0x5e   : > { %621 = vst [vmem:[%s1208_s13 + $0xe8] sm:$0xff] %v557_v27  ;;  %v574_v14 = vadd.f32 %v890_v10, %v254_v9  ;;  %v892_v16 = vld [vmem:[%s1188_s8 + $0x30] ss:$0 sm:$0xff]  ;;  %v575_v17 = vadd.f32 %v891_v13, %v255_v12  ;;  %v257_v18 = vld [vmem:[%s1180_s14 + $0x188] sm:$0xff]  ;;  %v893_v19 = vld [vmem:[%s1188_s8 + $0x31] ss:$0 sm:$0xff] }
  0x5f   : > { %622 = vst [vmem:[%s1208_s13 + $0xf0] sm:$0xff] %v558_v30  ;;  %v576_v20 = vadd.f32 %v892_v16, %v256_v15  ;;  %v894_v22 = vld [vmem:[%s1188_s8 + $0x32] ss:$0 sm:$0xff]  ;;  %v577_v23 = vadd.f32 %v893_v19, %v257_v18  ;;  %v259_v24 = vld [vmem:[%s1180_s14 + $0x198] sm:$0xff]  ;;  %v895_v25 = vld [vmem:[%s1188_s8 + $0x33] ss:$0 sm:$0xff] }
  0x60   : > { %623 = vst [vmem:[%s1208_s13 + $0xf8] sm:$0xff] %v559_v33  ;;  %v578_v26 = vadd.f32 %v894_v22, %v258_v21  ;;  %v260_v27 = vld [vmem:[%s1180_s14 + $0x1a0] sm:$0xff]  ;;  %v896_v28 = vld [vmem:[%s1188_s8 + $0x34] ss:$0 sm:$0xff]  ;;  %v579_v29 = vadd.f32 %v895_v25, %v259_v24  ;;  %v261_v30 = vld [vmem:[%s1180_s14 + $0x1a8] sm:$0xff] }
  0x61   : > { %624 = vst [vmem:[%s1208_s13 + $0x100] sm:$0xff] %v560_v36  ;;  %v897_v31 = vld [vmem:[%s1188_s8 + $0x35] ss:$0 sm:$0xff]  ;;  %v580_v32 = vadd.f32 %v896_v28, %v260_v27  ;;  %v898_v34 = vld [vmem:[%s1188_s8 + $0x36] ss:$0 sm:$0xff]  ;;  %v263_v36 = vld [vmem:[%s1180_s14 + $0x1b8] sm:$0xff] }
  0x62   : > { %625 = vst [vmem:[%s1208_s13 + $0x108] sm:$0xff] %v561_v39  ;;  %v262_v33 = vld [vmem:[%s1180_s14 + $0x1b0] sm:$0xff]  ;;  %v581_v35 = vadd.f32 %v897_v31, %v261_v30  ;;  %v264_v39 = vld [vmem:[%s1180_s14 + $0x1c0] sm:$0xff]  ;;  %v900_v40 = vld [vmem:[%s1188_s8 + $0x38] ss:$0 sm:$0xff] }
  0x63   : > { %626 = vst [vmem:[%s1208_s13 + $0x110] sm:$0xff] %v562_v42  ;;  %v899_v37 = vld [vmem:[%s1188_s8 + $0x37] ss:$0 sm:$0xff]  ;;  %v582_v38 = vadd.f32 %v898_v34, %v262_v33  ;;  %v265_v42 = vld [vmem:[%s1180_s14 + $0x1c8] sm:$0xff]  ;;  %v901_v43 = vld [vmem:[%s1188_s8 + $0x39] ss:$0 sm:$0xff]  ;;  %v584_v44 = vadd.f32 %v900_v40, %v264_v39 }
  0x64   : > { %627 = vst [vmem:[%s1208_s13 + $0x118] sm:$0xff] %v563_v45  ;;  %v583_v41 = vadd.f32 %v899_v37, %v263_v36  ;;  %v266_v45 = vld [vmem:[%s1180_s14 + $0x1d0] sm:$0xff]  ;;  %v902_v46 = vld [vmem:[%s1188_s8 + $0x3a] ss:$0 sm:$0xff]  ;;  %v585_v47 = vadd.f32 %v901_v43, %v265_v42  ;;  %v903_v49 = vld [vmem:[%s1188_s8 + $0x3b] ss:$0 sm:$0xff] }
  0x65   : > { %628 = vst [vmem:[%s1208_s13 + $0x120] sm:$0xff] %v564_v48  ;;  %v267_v48 = vld [vmem:[%s1180_s14 + $0x1d8] sm:$0xff]  ;;  %v586_v50 = vadd.f32 %v902_v46, %v266_v45 }
  0x66   : > { %629 = vst [vmem:[%s1208_s13 + $0x128] sm:$0xff] %v565_v51  ;;  %v268_v51 = vld [vmem:[%s1180_s14 + $0x1e0] sm:$0xff]  ;;  %v904_v52 = vld [vmem:[%s1188_s8 + $0x3c] ss:$0 sm:$0xff]  ;;  %v587_v53 = vadd.f32 %v903_v49, %v267_v48  ;;  %v905_v55 = vld [vmem:[%s1188_s8 + $0x3d] ss:$0 sm:$0xff] }
  0x67   : > { %630 = vst [vmem:[%s1208_s13 + $0x130] sm:$0xff] %v566_v54  ;;  %v269_v54 = vld [vmem:[%s1180_s14 + $0x1e8] sm:$0xff]  ;;  %v588_v56 = vadd.f32 %v904_v52, %v268_v51  ;;  %v906_v58 = vld [vmem:[%s1188_s8 + $0x3e] ss:$0 sm:$0xff]  ;;  %v907_v61 = vld [vmem:[%s1188_s8 + $0x3f] ss:$0 sm:$0xff] }
  0x68   : > { %631 = vst [vmem:[%s1208_s13 + $0x138] sm:$0xff] %v567_v57  ;;  %v270_v57 = vld [vmem:[%s1180_s14 + $0x1f0] sm:$0xff]  ;;  %v589_v59 = vadd.f32 %v905_v55, %v269_v54 }
  0x69   : > { %632 = vst [vmem:[%s1208_s13 + $0x140] sm:$0xff] %v568_v60  ;;  %v271_v60 = vld [vmem:[%s1180_s14 + $0x1f8] sm:$0xff]  ;;  %v590_v62 = vadd.f32 %v906_v58, %v270_v57 }
  0x6a   : > { %633 = vst [vmem:[%s1208_s13 + $0x148] sm:$0xff] %v569_v63  ;;  %v591_v63 = vadd.f32 %v907_v61, %v271_v60 }
  0x6b   : > { %634 = vst [vmem:[%s1208_s13 + $0x150] sm:$0xff] %v570_v2 }
  0x6c   : > { %635 = vst [vmem:[%s1208_s13 + $0x158] sm:$0xff] %v571_v5 }
  0x6d   : > { %636 = vst [vmem:[%s1208_s13 + $0x160] sm:$0xff] %v572_v8 }
  0x6e   : > { %637 = vst [vmem:[%s1208_s13 + $0x168] sm:$0xff] %v573_v11 }
  0x6f   : > { %638 = vst [vmem:[%s1208_s13 + $0x170] sm:$0xff] %v574_v14 }
  0x70   : > { %639 = vst [vmem:[%s1208_s13 + $0x178] sm:$0xff] %v575_v17 }
  0x71   : > { %640 = vst [vmem:[%s1208_s13 + $0x180] sm:$0xff] %v576_v20 }
  0x72   : > { %641 = vst [vmem:[%s1208_s13 + $0x188] sm:$0xff] %v577_v23 }
  0x73   : > { %642 = vst [vmem:[%s1208_s13 + $0x190] sm:$0xff] %v578_v26 }
  0x74   : > { %643 = vst [vmem:[%s1208_s13 + $0x198] sm:$0xff] %v579_v29 }
  0x75   : > { %644 = vst [vmem:[%s1208_s13 + $0x1a0] sm:$0xff] %v580_v32 }
  0x76   : > { %645 = vst [vmem:[%s1208_s13 + $0x1a8] sm:$0xff] %v581_v35 }
  0x77   : > { %646 = vst [vmem:[%s1208_s13 + $0x1b0] sm:$0xff] %v582_v38 }
  0x78   : > { %647 = vst [vmem:[%s1208_s13 + $0x1b8] sm:$0xff] %v583_v41 }
  0x79   : > { %648 = vst [vmem:[%s1208_s13 + $0x1c0] sm:$0xff] %v584_v44 }
  0x7a   : > { %649 = vst [vmem:[%s1208_s13 + $0x1c8] sm:$0xff] %v585_v47 }
  0x7b   : > { %650 = vst [vmem:[%s1208_s13 + $0x1d0] sm:$0xff] %v586_v50 }
  0x7c   : > { %651 = vst [vmem:[%s1208_s13 + $0x1d8] sm:$0xff] %v587_v53 }
  0x7d   : > { %652 = vst [vmem:[%s1208_s13 + $0x1e0] sm:$0xff] %v588_v56 }
  0x7e   : > { %653 = vst [vmem:[%s1208_s13 + $0x1e8] sm:$0xff] %v589_v59 }
  0x7f   : > { %654 = vst [vmem:[%s1208_s13 + $0x1f0] sm:$0xff] %v590_v62 }
  0x80   : > { %655 = vst [vmem:[%s1208_s13 + $0x1f8] sm:$0xff] %v591_v63 }
  0x81   : > { %995 = shalt.err (!%p992_p13)
}
  0x82   : > { %s1044_s30 = smov 128   ;;  %s1045_s14 = smov 8  }
  0x83   : > { %791 = dma.vmem_to_hbm [thread:$0]  (%p1110_p10), %s670_s29, 8192, %s672_s3, %s657_s5, %s1044_s30, %s1044_s30, %s1045_s14  }
  0x84 PF: > { %p805_p0 = scmp.ge.s32.totalorder %s1038_s12, 2  ;;  %s686_s4 = sand.u32 1, %s1026_s9  }
  0x85   : > { %s687_s26 = scalar_lea.sflag [#allocation4], %s686_s4 }
  0x86   : > { %p801_p4 = pnand %p805_p0, %p1114_p11 }
  0x88   : > { %p802_p5 = pneg %p801_p4 }
  0x8a   : > { %1021 = dma.done.wait (%p802_p5), %s687_s26, 8192  }
  0x8b   : > { %1023 = vsyncadd (%p802_p5), %s687_s26, 4294959104  ;;  %p18_p7 = scmp.ge.s32.totalorder %s1086_s15, 6   ;;  %s1437_s9 = smov %s1030_s10 }
  0x8c   : > { %s1438_s10 = smov %s1034_s11  ;;  %s1439_s11 = smov %s1098_s18 }
  0x8d   : > { %s1440_s12 = smov %s1086_s15  ;;  %20 = sbr.rel (!%p18_p7) target bundleno = 7 (0x7), region = 86 }
  0x92   :  { %693 = vsyncpa [#allocation3], 1 }
  0x93   :  { %695 = vsyncpa [#allocation3 + $0x1], 1 }
  0x94   :  { %696 = vsyncpa [#allocation6], 1 }
  0x95   :  { %698 = vsyncpa [#allocation6 + $0x1], 1 }
  0x96   :  { %699 = vsyncpa [#allocation4], 1 }
  0x97   :  { %701 = vsyncpa [#allocation4 + $0x1], 1 }

</bundles_post_ra>
